<compile_context>
chip_gen: v7x
topology: tpu7x:2x2x1
jax: 0.10.0
libtpu: 0.0.40
codegen_flags: <defaults>
</compile_context>

<pallas_src>
import functools

import jax
import jax.numpy as jnp
from jax import lax
from jax.experimental import pallas as pl
from jax.experimental.pallas import tpu as pltpu

EPS = 1e-5  # F.instance_norm default


def _residule_block_kernel(patch_ref, w_ref, x_ref, o_ref):
    """One batch tile per grid step.

    patch_ref: (bt, K, S)  im2col of reflect-padded x; K = ks*ks*C, S = H*W
    w_ref:     (C, K)      conv weight, k-order = (dy, dx, cin)
    x_ref:     (bt, C, S)  residual input
    o_ref:     (bt, C, S)  output
    """
    bt = patch_ref.shape[0]
    w = w_ref[...]                                    # (C, K), loaded once
    for bi in range(bt):                              # static unroll, bt small
        # relu commutes with reflect-pad / im2col (they only copy elements),
        # so relu on the gathered patches == pad(relu(x)) of the module.
        patches = jnp.maximum(patch_ref[bi], 0.0)     # (K, S)
        # conv2d (VALID, stride 1) as a single channel-and-tap contraction.
        y = jnp.dot(w, patches, preferred_element_type=jnp.float32)  # (C, S)
        # instance norm (biased variance, no affine) — one-pass statistics.
        inv_n = 1.0 / y.shape[-1]
        mean = jnp.sum(y, axis=-1, keepdims=True) * inv_n
        ex2 = jnp.sum(y * y, axis=-1, keepdims=True) * inv_n
        var = ex2 - mean * mean
        y = (y - mean) * lax.rsqrt(var + EPS)
        # residual add + lane-dense store.
        o_ref[bi] = (y + x_ref[bi]).astype(o_ref.dtype)


def residule_block_forward(x_nchw, w2_oihw, *, ks=3, bt=1):
    """instance_norm(conv2d(reflect_pad(relu(x)), w2)) + x, NCHW in/out."""
    B, C, H, W = x_nchw.shape
    p = (ks - 1) // 2
    assert p < H and p < W, "reflect pad requires pad < spatial size"
    assert B % bt == 0, "batch tile must divide batch"
    S = H * W
    K = ks * ks * C

    # ---- wrapper-side layout plumbing (no module compute hoisted) ----------
    # PyTorch-style reflect pad (edge not repeated) + im2col gather.
    xp = jnp.pad(x_nchw, ((0, 0), (0, 0), (p, p), (p, p)), mode="reflect")
    taps = [xp[:, :, dy:dy + H, dx:dx + W]
            for dy in range(ks) for dx in range(ks)]          # each (B, C, H, W)
    patches = jnp.stack(taps, axis=1).reshape(B, K, S)        # k = (dy*ks+dx)*C + cin
    # conv weight (Cout, Cin, kh, kw) -> (Cout, kh*kw*Cin) in the same k order.
    w2d = jnp.transpose(w2_oihw, (0, 2, 3, 1)).reshape(C, K)
    x_flat = x_nchw.reshape(B, C, S)

    out_flat = pl.pallas_call(
        _residule_block_kernel,
        out_shape=jax.ShapeDtypeStruct((B, C, S), x_nchw.dtype),
        grid=(B // bt,),
        in_specs=[
            pl.BlockSpec((bt, K, S), lambda i: (i, 0, 0)),
            pl.BlockSpec((C, K), lambda i: (0, 0)),
            pl.BlockSpec((bt, C, S), lambda i: (i, 0, 0)),
        ],
        out_specs=pl.BlockSpec((bt, C, S), lambda i: (i, 0, 0)),
        compiler_params=pltpu.CompilerParams(
            dimension_semantics=("parallel",)),
    )(patches, w2d, x_flat)
    return out_flat.reshape(B, C, H, W)


def _reference_nchw(x_nchw, w2_oihw, b2, ks=3):
    """Plain-JAX replica of the PyTorch forward (effective c2 path), WITH bias."""
    p = (ks - 1) // 2
    xr = jnp.maximum(x_nchw, 0.0)
    xp = jnp.pad(xr, ((0, 0), (0, 0), (p, p), (p, p)), mode="reflect")
    y = lax.conv_general_dilated(
        xp, w2_oihw, window_strides=(1, 1), padding="VALID",
        dimension_numbers=("NCHW", "OIHW", "NCHW"))
    y = y + b2.reshape(1, -1, 1, 1)
    mean = jnp.mean(y, axis=(2, 3), keepdims=True)
    var = jnp.mean((y - mean) ** 2, axis=(2, 3), keepdims=True)
    y = (y - mean) / jnp.sqrt(var + EPS)
    return y + x_nchw


if __name__ == "__main__":
    B, C, H, W, ks = 2, 4, 16, 16, 3

    key = jax.random.PRNGKey(0)
    kx, kw1, kb1, kw2, kb2 = jax.random.split(key, 5)
    bound = 1.0 / float(C * ks * ks) ** 0.5        # PyTorch conv init range

    x_nchw = jax.random.normal(kx, (B, C, H, W), jnp.float32)
    # c1 parameters exist in __init__ but their branch result is overwritten in
    # the PyTorch forward, so they never affect the output (kept only to mirror
    # the module's parameter set).
    w1 = jax.random.uniform(kw1, (C, C, ks, ks), jnp.float32, -bound, bound)
    b1 = jax.random.uniform(kb1, (C,), jnp.float32, -bound, bound)
    w2 = jax.random.uniform(kw2, (C, C, ks, ks), jnp.float32, -bound, bound)
    b2 = jax.random.uniform(kb2, (C,), jnp.float32, -bound, bound)

    fwd = jax.jit(functools.partial(residule_block_forward, ks=ks, bt=1))
    out = jax.block_until_ready(fwd(x_nchw, w2))

    # The reference keeps the conv bias; the kernel drops it because a
    # per-channel constant is cancelled exactly by the no-affine instance norm.
    ref = _reference_nchw(x_nchw, w2, b2, ks=ks)
    max_err = float(jnp.max(jnp.abs(out - ref)))
    assert jnp.allclose(out, ref, atol=1e-4, rtol=1e-4), max_err

    print("KERNEL_OK")
</pallas_src>

<mosaic_0001>
module attributes {stable_mosaic.version = 11 : i64} {
  func.func @_residule_block_kernel(%arg0: i32, %arg1: memref<1x36x256xf32, #tpu.memory_space<vmem>>, %arg2: memref<4x36xf32, #tpu.memory_space<vmem>>, %arg3: memref<1x4x256xf32, #tpu.memory_space<vmem>>, %arg4: memref<1x4x256xf32, #tpu.memory_space<vmem>>) attributes {dimension_semantics = [#tpu.dimension_semantics<parallel>], iteration_bounds = array<i64: 2>, scalar_prefetch = 0 : i64, scratch_operands = 0 : i64, tpu.core_type = #tpu.core_type<tc>, window_params = [{transform_indices = @transform_0, window_bounds = array<i64: 1, 36, 256>}, {pipeline_mode = #tpu.pipeline_mode<synchronous>, transform_indices = @transform_1, window_bounds = array<i64: 4, 36>}, {transform_indices = @transform_2, window_bounds = array<i64: 1, 4, 256>}, {transform_indices = @transform_3, window_bounds = array<i64: 1, 4, 256>}]} {
    %c0 = arith.constant 0 : index
    %c0_0 = arith.constant 0 : index
    %0 = vector.load %arg2[%c0, %c0_0] : memref<4x36xf32, #tpu.memory_space<vmem>>, vector<4x36xf32>
    %c0_1 = arith.constant 0 : index
    %c0_2 = arith.constant 0 : index
    %c0_3 = arith.constant 0 : index
    %1 = vector.load %arg1[%c0_1, %c0_2, %c0_3] : memref<1x36x256xf32, #tpu.memory_space<vmem>>, vector<1x36x256xf32>
    %2 = vector.shape_cast %1 : vector<1x36x256xf32> to vector<36x256xf32>
    %cst = arith.constant 0.000000e+00 : f32
    %3 = vector.broadcast %cst : f32 to vector<36x256xf32>
    %4 = arith.maximumf %2, %3 : vector<36x256xf32>
    %cst_4 = arith.constant dense<0.000000e+00> : vector<4x256xf32>
    %5 = tpu.matmul %0, %4, %cst_4 {dimension_numbers = #tpu.dot_dimension_numbers<[1], [0], [0], [1], [0, 0, 1, 1], [], []>} : vector<4x36xf32>, vector<36x256xf32>, vector<4x256xf32> -> vector<4x256xf32>
    %cst_5 = arith.constant dense<0.000000e+00> : vector<4xf32>
    %6 = vector.multi_reduction <add>, %5, %cst_5 [1] : vector<4x256xf32> to vector<4xf32>
    %7 = vector.shape_cast %6 : vector<4xf32> to vector<4x1xf32>
    %cst_6 = arith.constant 3.906250e-03 : f32
    %8 = vector.broadcast %cst_6 : f32 to vector<4x1xf32>
    %9 = arith.mulf %7, %8 : vector<4x1xf32>
    %10 = arith.mulf %5, %5 : vector<4x256xf32>
    %cst_7 = arith.constant dense<0.000000e+00> : vector<4xf32>
    %11 = vector.multi_reduction <add>, %10, %cst_7 [1] : vector<4x256xf32> to vector<4xf32>
    %12 = vector.shape_cast %11 : vector<4xf32> to vector<4x1xf32>
    %cst_8 = arith.constant 3.906250e-03 : f32
    %13 = vector.broadcast %cst_8 : f32 to vector<4x1xf32>
    %14 = arith.mulf %12, %13 : vector<4x1xf32>
    %15 = arith.mulf %9, %9 : vector<4x1xf32>
    %16 = arith.subf %14, %15 : vector<4x1xf32>
    %17 = vector.broadcast %9 : vector<4x1xf32> to vector<4x256xf32>
    %18 = arith.subf %5, %17 : vector<4x256xf32>
    %cst_9 = arith.constant 9.99999974E-6 : f32
    %19 = vector.broadcast %cst_9 : f32 to vector<4x1xf32>
    %20 = arith.addf %16, %19 : vector<4x1xf32>
    %21 = math.rsqrt %20 : vector<4x1xf32>
    %22 = vector.broadcast %21 : vector<4x1xf32> to vector<4x256xf32>
    %23 = arith.mulf %18, %22 : vector<4x256xf32>
    %c0_10 = arith.constant 0 : index
    %c0_11 = arith.constant 0 : index
    %c0_12 = arith.constant 0 : index
    %24 = vector.load %arg3[%c0_10, %c0_11, %c0_12] : memref<1x4x256xf32, #tpu.memory_space<vmem>>, vector<1x4x256xf32>
    %25 = vector.shape_cast %24 : vector<1x4x256xf32> to vector<4x256xf32>
    %26 = arith.addf %23, %25 : vector<4x256xf32>
    %c0_13 = arith.constant 0 : index
    %c0_14 = arith.constant 0 : index
    %c0_15 = arith.constant 0 : index
    %27 = vector.load %arg4[%c0_13, %c0_14, %c0_15] : memref<1x4x256xf32, #tpu.memory_space<vmem>>, vector<1x4x256xf32>
    %28 = vector.shape_cast %27 : vector<1x4x256xf32> to vector<4x256xf32>
    %29 = vector.shape_cast %26 : vector<4x256xf32> to vector<1x4x256xf32>
    tpu.vector_store %arg4[%c0_13, %c0_14, %c0_15], %29 {strides = array<i32>} : memref<1x4x256xf32, #tpu.memory_space<vmem>>, vector<1x4x256xf32>,
    return
  }
  func.func @transform_0(%arg0: i32) -> (i32, i32, i32) {
    %c0_i32 = arith.constant 0 : i32
    %c0_i32_0 = arith.constant 0 : i32
    %c0_i32_1 = arith.constant 0 : i32
    return %arg0, %c0_i32, %c0_i32_0 : i32, i32, i32
  }
  func.func @transform_1(%arg0: i32) -> (i32, i32) {
    %c0_i32 = arith.constant 0 : i32
    %c0_i32_0 = arith.constant 0 : i32
    %c0_i32_1 = arith.constant 0 : i32
    return %c0_i32, %c0_i32_0 : i32, i32
  }
  func.func @transform_2(%arg0: i32) -> (i32, i32, i32) {
    %c0_i32 = arith.constant 0 : i32
    %c0_i32_0 = arith.constant 0 : i32
    %c0_i32_1 = arith.constant 0 : i32
    return %arg0, %c0_i32, %c0_i32_0 : i32, i32, i32
  }
  func.func @transform_3(%arg0: i32) -> (i32, i32, i32) {
    %c0_i32 = arith.constant 0 : i32
    %c0_i32_0 = arith.constant 0 : i32
    %c0_i32_1 = arith.constant 0 : i32
    return %arg0, %c0_i32, %c0_i32_0 : i32, i32, i32
  }
}

</mosaic_0001>

<bundles_post_ra>
// kernel: residule_block_forward.1
= control target key start
LH: loop header
LB: loop body
LE: loop exit
PB: predicated region body
PF: predicated region fallthrough
CT: control target
= control target key end

     0   :  { %s461_s12 = smov 0   ;;  %s494_s0 = inlined_call_operand.vmem [shape: f32[2,36,256], index: 0, kind: input, shape index: {}]   ;;  %s495_s1 = inlined_call_operand.vmem [shape: f32[4,36], index: 1, kind: input, shape index: {}]   ;;  %s496_s2 = inlined_call_operand.vmem [shape: f32[2,4,256], index: 2, kind: input, shape index: {}]   ;;  %s497_s3 = inlined_call_operand.vmem [shape: f32[2,4,256], index: 3, kind: output, shape index: {}]  }
   0x1 LB: > { %s394_s13 = sadd.s32 4294967295, %s438_s12   ;;  %p398_p0 = scmp.ge.s32.totalorder %s438_s12, 1  ;;  %s438_s12 = sphi %s461_s12, %s13_s12  }
   0x2   : > { %p147_p1 = scmp.lt.s32.totalorder %s438_s12, 3 }
   0x4   : > { %p148_p2 = pnand %p398_p0, %p147_p1 }
   0x5   : > { %p176_p3 = scmp.lt.s32.totalorder (!%p148_p2), %s394_s13, 1  ;;  %v440_v0 = vmov (!%p148_p2), 0.0   ;;  %vm216_vm0 = vcmask (!%p148_p2), 1043456   ;;  %v191_v25 = vld [vmem:[%s495_s1] sm:$0xf] (!%p148_p2)  ;;  %vm212_vm1 = vcmask (!%p148_p2), 293888  }
   0x6   : > { %151 = sbr.rel (%p148_p2) target bundleno = 418 (0x1a2), region = 32  ;;  %287 = vmatprep.mubr.f32.mxu0 (!%p148_p2), %v440_v0 }
   0xd   : > { %s499_s13 = smov (!%p176_p3, %s394_s13), 1 }
   0xe   : > { %s419_s14 = smul.u32 80, %s499_s13  ;;  %s409_s20 = sshll.u32 %s499_s13, 3 }
   0xf   : > { %s185_s23 = scalar_lea.vmem %s496_s2, %s409_s20  ;;  %s190_s26 = scalar_lea.vmem %s497_s3, %s409_s20 }
  0x10   : > { %s180_s17 = scalar_lea.vmem %s494_s0, %s419_s14  ;;  %v316_v43 = vld [vmem:[%s185_s23] sm:$0xff] }
  0x11   : > { %v193_v1 = vld [vmem:[%s180_s17 + $0x8] sm:$0xff]  ;;  %v195_v2 = vld [vmem:[%s180_s17 + $0x18] sm:$0xff]  ;;  %v192_v3 = vld [vmem:[%s180_s17] sm:$0xff]  ;;  %v318_v46 = vcombine.high %v316_v43, %v316_v43 }
  0x12   : > { %v203_v4 = vmax.f32 %v193_v1, 0.0  ;;  %v205_v5 = vmax.f32 %v195_v2, 0.0  ;;  %v194_v6 = vld [vmem:[%s180_s17 + $0x10] sm:$0xff]  ;;  %v202_v7 = vmax.f32 %v192_v3, 0.0  ;;  %v197_v8 = vld [vmem:[%s180_s17 + $0x28] sm:$0xff]  ;;  %v199_v9 = vld [vmem:[%s180_s17 + $0x38] sm:$0xff] }
  0x13   : > { %v204_v10 = vmax.f32 %v194_v6, 0.0  ;;  %v207_v11 = vmax.f32 %v197_v8, 0.0  ;;  %v209_v12 = vmax.f32 %v199_v9, 0.0  ;;  %v196_v13 = vld [vmem:[%s180_s17 + $0x20] sm:$0xff]  ;;  %v198_v14 = vld [vmem:[%s180_s17 + $0x30] sm:$0xff] }
  0x14   : > { %v411_v15 = vpack.c.bf16 %v205_v5, %v203_v4  ;;  %v206_v16 = vmax.f32 %v196_v13, 0.0  ;;  %v208_v17 = vmax.f32 %v198_v14, 0.0  ;;  %v201_v20 = vld [vmem:[%s180_s17 + $0x48] sm:$0xf]  ;;  %v200_v23 = vld [vmem:[%s180_s17 + $0x40] sm:$0xf] }
  0x15   : > { %v413_v18 = vpack.c.bf16 %v204_v10, %v202_v7  ;;  %v415_v19 = vpack.c.bf16 %v209_v12, %v207_v11  ;;  %v211_v22 = vmax.f32 %v201_v20, 0.0  ;;  %v210_v24 = vmax.f32 %v200_v23, 0.0 }
  0x16   : > { %412 = vmatprep.subr.bf16.mxu0 %v411_v15  ;;  %v417_v21 = vpack.c.bf16 %v208_v17, %v206_v16 }
  0x17   : > { %414 = vmatpush1.bf16.msra.mxu0 %v413_v18 }
  0x18   : > { %416 = vmatprep.subr.bf16.mxu0 %v415_v19 }
  0x1b   : > { %418 = vmatpush1.bf16.msra.mxu0 %v417_v21 }
  0x1c   : > { %404 = vmatprep.subr.msk.mxu0 %vm216_vm0, %v211_v22 }
  0x1f   : > { %405 = vmatpush1.msk.msra.mxu0 %vm216_vm0, %v210_v24 }
  0x20   : > { %406 = vmatmul.mubr.msk.f32.vlgmr.msra.gmra.mrb[0].mxu0 %vm212_vm1, %v191_v25 }
  0xf3   : > { %v289_v26 = vpop.f32.mrb[0].mxu0 }
  0xf4   : > { %v300_v27 = vmul.f32 %v289_v26, %v289_v26  ;;  %v291_v28 = vpop.f32.mrb[1].mxu0  ;;  %v294_v29 = vsel %vm216_vm0, %v289_v26, 0.0 }
  0xf5   : > { %v301_v30 = vmul.f32 %v291_v28, %v291_v28  ;;  %v295_v31 = vsel %vm216_vm0, %v291_v28, 0.0 }
  0xf6   : > { %v296_v32 = vadd.f32 %v295_v31, %v294_v29  ;;  %v302_v33 = vsel %vm216_vm0, %v300_v27, 0.0 }
  0xf7   : > { %v303_v34 = vsel %vm216_vm0, %v301_v30, 0.0 }
  0xf8   : > { %297 = vadd.xlane.f32.xlu0 %v296_v32  ;;  %v304_v35 = vadd.f32 %v303_v34, %v302_v33 }
  0xfc   : > { %305 = vadd.xlane.f32.xlu0 %v304_v35 }
 0x185   : > { %v298_v36 = vpop.xlane.xlu0 %297 }
 0x186   : > { %v299_v37 = vmul.f32 0.00390625, %v298_v36 }
 0x188   : > { %v308_v39 = vmul.f32 %v299_v37, %v299_v37  ;;  %v310_v44 = vsub.f32 %v289_v26, %v299_v37  ;;  %v311_v45 = vsub.f32 %v291_v28, %v299_v37 }
 0x189   : > { %v306_v38 = vpop.xlane.xlu0 %305 }
 0x18a   : > { %v307_v40 = vmul.f32 0.00390625, %v306_v38 }
 0x18c   : > { %v309_v41 = vsub.f32 %v307_v40, %v308_v39 }
 0x18e   : > { %v312_v42 = vadd.f32 1e-05, %v309_v41 }
 0x190   : > { %430 = vrsqrt.f32 %v312_v42 }
 0x19a   : > { %v431_v47 = vpop.eup %430 }
 0x19b   : > { %v314_v48 = vmul.f32 %v431_v47, %v310_v44  ;;  %v315_v49 = vmul.f32 %v431_v47, %v311_v45 }
 0x19d   : > { %v320_v50 = vadd.f32 %v316_v43, %v314_v48  ;;  %v321_v51 = vadd.f32 %v318_v46, %v315_v49 }
 0x19f   : > { %v324_v52 = vcombine.low %v320_v50, %v321_v51 }
 0x1a1   : > { %326 = vst [vmem:[%s190_s26] sm:$0xff] %v324_v52 }
 0x1a2 PF: > { %s13_s12 = sadd.s32 1, %s438_s12  }
 0x1a3   : > { %p10_p4 = scmp.ge.s32.totalorder %s13_s12, 4  }
 0x1a5   :  { %12 = sbr.rel (!%p10_p4) target bundleno = 1 (0x1), region = 65 }

</bundles_post_ra>
